<compile_context>
chip_gen: v6e
topology: v6e:2x2x1
jax: 0.10.0
libtpu: 0.0.40
codegen_flags: <defaults>
</compile_context>

<pallas_src>
import functools
import math

import jax
import jax.numpy as jnp
from jax import lax
from jax.experimental import pallas as pl
from jax.experimental.pallas import tpu as pltpu
import numpy as np


def gat_kernel(x_ref, w_src_ref, w_dst_ref, att_src_mat_ref, att_dst_mat_ref,
               head_expand_ref, row_ref, col_ref, col_lane_ref,
               out_ref,
               xs_scr, asrc_scr, adst_scr, m_scr, l_scr, acc_scr,
               *, heads, out_channels, num_nodes):
    H, C, N = heads, out_channels, num_nodes
    HC = H * C
    step = pl.program_id(0)
    last = pl.num_programs(0) - 1

    # ---------------- one-time setup at the first edge tile -----------------
    @pl.when(step == 0)
    def _init():
        x_bf = x_ref[...].astype(jnp.bfloat16)
        xs = jnp.dot(x_bf, w_src_ref[...].astype(jnp.bfloat16),
                     preferred_element_type=jnp.float32)            # [N, H*C]
        xd = jnp.dot(x_bf, w_dst_ref[...].astype(jnp.bfloat16),
                     preferred_element_type=jnp.float32)            # [N, H*C]
        # all-heads attention logits via block-diagonal attention matrices
        a_src = jnp.dot(xs, att_src_mat_ref[...],
                        preferred_element_type=jnp.float32)          # [N, H]
        a_dst = jnp.dot(xd, att_dst_mat_ref[...],
                        preferred_element_type=jnp.float32)          # [N, H]
        xs_scr[...] = xs.astype(jnp.bfloat16)
        asrc_scr[...] = a_src.astype(jnp.bfloat16)
        adst_scr[...] = a_dst.astype(jnp.bfloat16)
        m_scr[...] = jnp.full_like(m_scr, -1e30)
        l_scr[...] = jnp.zeros_like(l_scr)
        acc_scr[...] = jnp.zeros_like(acc_scr)

    # ---------------- per edge-tile work -------------------------------------
    row_ids = row_ref[...]                       # [TE, 1] int32 (sentinel == N)
    col_ids = col_ref[...]                       # [TE, 1] int32
    col_lane = col_lane_ref[0]                   # [1, TE] int32
    TE = row_ids.shape[0]

    # bf16 one-hot incidence tiles, MXU-native orientations (0/1 exact in bf16)
    iota_en = lax.broadcasted_iota(jnp.int32, (TE, N), 1)
    gt_row = jnp.where(iota_en == row_ids, 1.0, 0.0).astype(jnp.bfloat16)   # [TE, N]
    gt_col = jnp.where(iota_en == col_ids, 1.0, 0.0).astype(jnp.bfloat16)   # [TE, N]
    iota_ne = lax.broadcasted_iota(jnp.int32, (N, TE), 0)
    gt_col_t = jnp.where(iota_ne == col_lane, 1.0, 0.0).astype(jnp.bfloat16)  # [N, TE]

    # batched-over-heads gathers (MXU)
    x_e = jnp.dot(gt_row, xs_scr[...], preferred_element_type=jnp.float32)    # [TE, H*C]
    a_s = jnp.dot(gt_row, asrc_scr[...], preferred_element_type=jnp.float32)  # [TE, H]
    a_d = jnp.dot(gt_col, adst_scr[...], preferred_element_type=jnp.float32)  # [TE, H]

    valid = row_ids < N                                    # padding sentinel == N
    alpha = jnp.where(valid, a_s + a_d, -1e30)             # [TE, H]

    # online softmax over the global edge dimension, independently per head
    m_prev = m_scr[...]                                    # [1, H]
    m_new = jnp.maximum(m_prev, jnp.max(alpha, axis=0, keepdims=True))
    corr = jnp.exp(m_prev - m_new)                         # [1, H]
    p = jnp.exp(alpha - m_new)                             # [TE, H]
    l_scr[...] = corr * l_scr[...] + jnp.sum(p, axis=0, keepdims=True)
    m_scr[...] = m_new

    # per-head -> per-channel broadcast as tiny block-diag matmuls (lane-dense)
    hexp = head_expand_ref[...]                            # [H, H*C]
    p_hc = jnp.dot(p, hexp, preferred_element_type=jnp.float32)       # [TE, H*C]
    corr_hc = jnp.dot(corr, hexp, preferred_element_type=jnp.float32)  # [1, H*C]

    # weighted messages + scatter-add to destination nodes (MXU)
    msg = (x_e * p_hc).astype(jnp.bfloat16)                # [TE, H*C]
    acc_scr[...] = acc_scr[...] * corr_hc + jnp.dot(
        gt_col_t, msg, preferred_element_type=jnp.float32)            # [N, H*C]

    # ---------------- finalize on the last edge tile -------------------------
    @pl.when(step == last)
    def _finalize():
        inv_l = pl.reciprocal(l_scr[...], approx=True)                 # [1, H]
        inv_hc = jnp.dot(inv_l, hexp, preferred_element_type=jnp.float32)
        out_ref[...] = acc_scr[...] * inv_hc                           # [N, H*C]


def lightweight_gat_conv(x, edge_index, w_src, w_dst, att_src, att_dst,
                         *, heads, out_channels, edge_tile=256):
    """Forward of LightweightGATConv.  Weights are pre-transposed [Din, H*C]."""
    N, Din = x.shape
    H, C = heads, out_channels
    HC = H * C
    E = edge_index.shape[1]
    TE = edge_tile
    if TE % 8 != 0:
        raise ValueError("edge_tile must be a multiple of 8")
    n_tiles = (E + TE - 1) // TE
    E_pad = n_tiles * TE
    pad = E_pad - E

    row = edge_index[0].astype(jnp.int32)
    col = edge_index[1].astype(jnp.int32)
    sentinel = jnp.full((pad,), N, dtype=jnp.int32)        # out-of-range node id
    row_p = jnp.concatenate([row, sentinel])
    col_p = jnp.concatenate([col, sentinel])
    row_2d = row_p.reshape(E_pad, 1)                       # column layout (gather)
    col_2d = col_p.reshape(E_pad, 1)                       # column layout (gather)
    col_lane = col_p.reshape(n_tiles, 1, TE)               # lane layout (scatter)

    # block-diagonal attention matrices: A[h*C+c, h'] = att[h, c] * (h == h')
    eye_h = jnp.eye(H, dtype=jnp.float32)
    att_src_mat = (att_src.astype(jnp.float32)[:, :, None] *
                   eye_h[:, None, :]).reshape(HC, H)
    att_dst_mat = (att_dst.astype(jnp.float32)[:, :, None] *
                   eye_h[:, None, :]).reshape(HC, H)
    # head-expand: E[h, h'*C+c] = (h == h')  (per-head -> per-channel broadcast)
    head_expand = jnp.repeat(eye_h, C, axis=1)             # [H, H*C]

    kernel = functools.partial(gat_kernel, heads=H, out_channels=C, num_nodes=N)

    grid_spec = pltpu.PrefetchScalarGridSpec(
        num_scalar_prefetch=0,
        grid=(n_tiles,),
        in_specs=[
            pl.BlockSpec((N, Din), lambda e: (0, 0)),      # x (resident)
            pl.BlockSpec((Din, HC), lambda e: (0, 0)),     # w_src
            pl.BlockSpec((Din, HC), lambda e: (0, 0)),     # w_dst
            pl.BlockSpec((HC, H), lambda e: (0, 0)),       # att_src_mat
            pl.BlockSpec((HC, H), lambda e: (0, 0)),       # att_dst_mat
            pl.BlockSpec((H, HC), lambda e: (0, 0)),       # head_expand
            pl.BlockSpec((TE, 1), lambda e: (e, 0)),       # row ids (edge-tiled)
            pl.BlockSpec((TE, 1), lambda e: (e, 0)),       # col ids (edge-tiled)
            pl.BlockSpec((1, 1, TE), lambda e: (e, 0, 0)),  # col ids, lane layout
        ],
        out_specs=pl.BlockSpec((N, HC), lambda e: (0, 0)),
        scratch_shapes=[
            pltpu.VMEM((N, HC), jnp.bfloat16),   # projected source features
            pltpu.VMEM((N, H), jnp.bfloat16),    # per-node a_src (all heads)
            pltpu.VMEM((N, H), jnp.bfloat16),    # per-node a_dst (all heads)
            pltpu.VMEM((1, H), jnp.float32),     # running max
            pltpu.VMEM((1, H), jnp.float32),     # running sum
            pltpu.VMEM((N, HC), jnp.float32),    # output accumulator
        ],
    )

    out_hc = pl.pallas_call(
        kernel,
        out_shape=jax.ShapeDtypeStruct((N, HC), jnp.float32),
        grid_spec=grid_spec,
        compiler_params=pltpu.CompilerParams(
            dimension_semantics=("arbitrary",),      # edge axis carries softmax state
            vmem_limit_bytes=32 * 1024 * 1024,       # safe on v5e/v6e/v7x
        ),
    )(x, w_src, w_dst, att_src_mat, att_dst_mat, head_expand,
      row_2d, col_2d, col_lane)

    # head mean: layout plumbing in the wrapper keeps the kernel output lane-dense.
    return out_hc.reshape(N, H, C).mean(axis=1)


# ---------------- pure-JAX reference (mirrors the PyTorch forward) -----------
def gat_reference(x, edge_index, w_src, w_dst, att_src, att_dst, H, C):
    N = x.shape[0]
    x_src = (x @ w_src).reshape(N, H, C)
    x_dst = (x @ w_dst).reshape(N, H, C)
    alpha_src = (x_src * att_src[None]).sum(-1)              # [N, H]
    alpha_dst = (x_dst * att_dst[None]).sum(-1)              # [N, H]
    row, col = edge_index[0], edge_index[1]
    alpha = alpha_src[row] + alpha_dst[col]                  # [E, H]
    alpha = jax.nn.softmax(alpha, axis=0)                    # global over edges
    msg = x_src[row] * alpha[:, :, None]                     # [E, H, C]
    out = jnp.zeros((N, H, C), jnp.float32).at[col].add(msg)
    return out.mean(axis=1)


def xavier_uniform(key, shape, fan_in, fan_out, gain):
    bound = gain * math.sqrt(6.0 / (fan_in + fan_out))
    return jax.random.uniform(key, shape, jnp.float32, -bound, bound)


if __name__ == "__main__":
    # Small, deterministic example consistent with the module.
    N, Din, C, H, E = 16, 8, 8, 4, 37   # E=37 exercises the ragged last edge tile

    key = jax.random.PRNGKey(0)
    k_x, k_e, k_ws, k_wd, k_as, k_ad = jax.random.split(key, 6)

    gain = math.sqrt(2.0)  # nn.init.calculate_gain('relu')
    # PyTorch lin weight is [H*C, Din]; we store the transpose [Din, H*C].
    w_src = xavier_uniform(k_ws, (Din, H * C), fan_in=Din, fan_out=H * C, gain=gain)
    w_dst = xavier_uniform(k_wd, (Din, H * C), fan_in=Din, fan_out=H * C, gain=gain)
    # att params: torch shape (1, H, C) -> fan_in = H*C, fan_out = C
    att_src = xavier_uniform(k_as, (H, C), fan_in=H * C, fan_out=C, gain=gain)
    att_dst = xavier_uniform(k_ad, (H, C), fan_in=H * C, fan_out=C, gain=gain)

    x = jax.random.normal(k_x, (N, Din), jnp.float32)
    edge_index = jax.random.randint(k_e, (2, E), 0, N, jnp.int32)

    out = lightweight_gat_conv(x, edge_index, w_src, w_dst, att_src, att_dst,
                               heads=H, out_channels=C, edge_tile=16)
    out = jax.block_until_ready(out)

    ref = gat_reference(x, edge_index, w_src, w_dst, att_src, att_dst, H, C)
    # bf16 MXU inputs + approx reciprocal => loosened (but still tight) tolerances.
    np.testing.assert_allclose(np.asarray(out), np.asarray(ref),
                               rtol=5e-2, atol=5e-3)
    print("KERNEL_OK")
</pallas_src>

<mosaic_0001>
module attributes {stable_mosaic.version = 11 : i64} {
  func.func @gat_kernel(%arg0: i32, %arg1: memref<16x8xf32, #tpu.memory_space<vmem>>, %arg2: memref<8x32xf32, #tpu.memory_space<vmem>>, %arg3: memref<8x32xf32, #tpu.memory_space<vmem>>, %arg4: memref<32x4xf32, #tpu.memory_space<vmem>>, %arg5: memref<32x4xf32, #tpu.memory_space<vmem>>, %arg6: memref<4x32xf32, #tpu.memory_space<vmem>>, %arg7: memref<16x1xi32, #tpu.memory_space<vmem>>, %arg8: memref<16x1xi32, #tpu.memory_space<vmem>>, %arg9: memref<1x1x16xi32, #tpu.memory_space<vmem>>, %arg10: memref<16x32xf32, #tpu.memory_space<vmem>>, %arg11: memref<16x32xbf16, #tpu.memory_space<vmem>>, %arg12: memref<16x4xbf16, #tpu.memory_space<vmem>>, %arg13: memref<16x4xbf16, #tpu.memory_space<vmem>>, %arg14: memref<1x4xf32, #tpu.memory_space<vmem>>, %arg15: memref<1x4xf32, #tpu.memory_space<vmem>>, %arg16: memref<16x32xf32, #tpu.memory_space<vmem>>) attributes {dimension_semantics = [#tpu.dimension_semantics<arbitrary>], iteration_bounds = array<i64: 3>, scalar_prefetch = 0 : i64, scratch_operands = 6 : i64, tpu.core_type = #tpu.core_type<tc>, window_params = [{pipeline_mode = #tpu.pipeline_mode<synchronous>, transform_indices = @transform_0, window_bounds = array<i64: 16, 8>}, {pipeline_mode = #tpu.pipeline_mode<synchronous>, transform_indices = @transform_1, window_bounds = array<i64: 8, 32>}, {pipeline_mode = #tpu.pipeline_mode<synchronous>, transform_indices = @transform_2, window_bounds = array<i64: 8, 32>}, {pipeline_mode = #tpu.pipeline_mode<synchronous>, transform_indices = @transform_3, window_bounds = array<i64: 32, 4>}, {pipeline_mode = #tpu.pipeline_mode<synchronous>, transform_indices = @transform_4, window_bounds = array<i64: 32, 4>}, {pipeline_mode = #tpu.pipeline_mode<synchronous>, transform_indices = @transform_5, window_bounds = array<i64: 4, 32>}, {transform_indices = @transform_6, window_bounds = array<i64: 16, 1>}, {transform_indices = @transform_7, window_bounds = array<i64: 16, 1>}, {transform_indices = @transform_8, window_bounds = array<i64: 1, 1, 16>}, {pipeline_mode = #tpu.pipeline_mode<synchronous>, transform_indices = @transform_9, window_bounds = array<i64: 16, 32>}]} {
    %c0_i32 = arith.constant 0 : i32
    %0 = arith.cmpi eq, %arg0, %c0_i32 : i32
    %1 = arith.extui %0 : i1 to i32
    %c0_i32_0 = arith.constant 0 : i32
    %2 = arith.cmpi ne, %1, %c0_i32_0 : i32
    scf.if %2 {
      %c0_42 = arith.constant 0 : index
      %c0_43 = arith.constant 0 : index
      %70 = vector.load %arg1[%c0_42, %c0_43] : memref<16x8xf32, #tpu.memory_space<vmem>>, vector<16x8xf32>
      %71 = arith.truncf %70 : vector<16x8xf32> to vector<16x8xbf16>
      %c0_44 = arith.constant 0 : index
      %c0_45 = arith.constant 0 : index
      %72 = vector.load %arg2[%c0_44, %c0_45] : memref<8x32xf32, #tpu.memory_space<vmem>>, vector<8x32xf32>
      %73 = arith.truncf %72 : vector<8x32xf32> to vector<8x32xbf16>
      %cst_46 = arith.constant dense<0.000000e+00> : vector<16x32xf32>
      %74 = tpu.matmul %71, %73, %cst_46 {dimension_numbers = #tpu.dot_dimension_numbers<[1], [0], [0], [1], [0, 0, 1, 1], [], []>} : vector<16x8xbf16>, vector<8x32xbf16>, vector<16x32xf32> -> vector<16x32xf32>
      %c0_47 = arith.constant 0 : index
      %c0_48 = arith.constant 0 : index
      %75 = vector.load %arg3[%c0_47, %c0_48] : memref<8x32xf32, #tpu.memory_space<vmem>>, vector<8x32xf32>
      %76 = arith.truncf %75 : vector<8x32xf32> to vector<8x32xbf16>
      %cst_49 = arith.constant dense<0.000000e+00> : vector<16x32xf32>
      %77 = tpu.matmul %71, %76, %cst_49 {dimension_numbers = #tpu.dot_dimension_numbers<[1], [0], [0], [1], [0, 0, 1, 1], [], []>} : vector<16x8xbf16>, vector<8x32xbf16>, vector<16x32xf32> -> vector<16x32xf32>
      %c0_50 = arith.constant 0 : index
      %c0_51 = arith.constant 0 : index
      %78 = vector.load %arg4[%c0_50, %c0_51] : memref<32x4xf32, #tpu.memory_space<vmem>>, vector<32x4xf32>
      %cst_52 = arith.constant dense<0.000000e+00> : vector<16x4xf32>
      %79 = tpu.matmul %74, %78, %cst_52 {dimension_numbers = #tpu.dot_dimension_numbers<[1], [0], [0], [1], [0, 0, 1, 1], [], []>} : vector<16x32xf32>, vector<32x4xf32>, vector<16x4xf32> -> vector<16x4xf32>
      %c0_53 = arith.constant 0 : index
      %c0_54 = arith.constant 0 : index
      %80 = vector.load %arg5[%c0_53, %c0_54] : memref<32x4xf32, #tpu.memory_space<vmem>>, vector<32x4xf32>
      %cst_55 = arith.constant dense<0.000000e+00> : vector<16x4xf32>
      %81 = tpu.matmul %77, %80, %cst_55 {dimension_numbers = #tpu.dot_dimension_numbers<[1], [0], [0], [1], [0, 0, 1, 1], [], []>} : vector<16x32xf32>, vector<32x4xf32>, vector<16x4xf32> -> vector<16x4xf32>
      %82 = arith.truncf %74 : vector<16x32xf32> to vector<16x32xbf16>
      %c0_56 = arith.constant 0 : index
      %c0_57 = arith.constant 0 : index
      %83 = vector.load %arg11[%c0_56, %c0_57] : memref<16x32xbf16, #tpu.memory_space<vmem>>, vector<16x32xbf16>
      tpu.vector_store %arg11[%c0_56, %c0_57], %82 {strides = array<i32>} : memref<16x32xbf16, #tpu.memory_space<vmem>>, vector<16x32xbf16>,
      %84 = arith.truncf %79 : vector<16x4xf32> to vector<16x4xbf16>
      %c0_58 = arith.constant 0 : index
      %c0_59 = arith.constant 0 : index
      %85 = vector.load %arg12[%c0_58, %c0_59] : memref<16x4xbf16, #tpu.memory_space<vmem>>, vector<16x4xbf16>
      tpu.vector_store %arg12[%c0_58, %c0_59], %84 {strides = array<i32>} : memref<16x4xbf16, #tpu.memory_space<vmem>>, vector<16x4xbf16>,
      %86 = arith.truncf %81 : vector<16x4xf32> to vector<16x4xbf16>
      %c0_60 = arith.constant 0 : index
      %c0_61 = arith.constant 0 : index
      %87 = vector.load %arg13[%c0_60, %c0_61] : memref<16x4xbf16, #tpu.memory_space<vmem>>, vector<16x4xbf16>
      tpu.vector_store %arg13[%c0_60, %c0_61], %86 {strides = array<i32>} : memref<16x4xbf16, #tpu.memory_space<vmem>>, vector<16x4xbf16>,
      %cst_62 = arith.constant -1.000000e+30 : f32
      %88 = vector.broadcast %cst_62 : f32 to vector<1x4xf32>
      %c0_63 = arith.constant 0 : index
      %c0_64 = arith.constant 0 : index
      %89 = vector.load %arg14[%c0_63, %c0_64] : memref<1x4xf32, #tpu.memory_space<vmem>>, vector<1x4xf32>
      tpu.vector_store %arg14[%c0_63, %c0_64], %88 {strides = array<i32>} : memref<1x4xf32, #tpu.memory_space<vmem>>, vector<1x4xf32>,
      %cst_65 = arith.constant 0.000000e+00 : f32
      %90 = vector.broadcast %cst_65 : f32 to vector<1x4xf32>
      %c0_66 = arith.constant 0 : index
      %c0_67 = arith.constant 0 : index
      %91 = vector.load %arg15[%c0_66, %c0_67] : memref<1x4xf32, #tpu.memory_space<vmem>>, vector<1x4xf32>
      tpu.vector_store %arg15[%c0_66, %c0_67], %90 {strides = array<i32>} : memref<1x4xf32, #tpu.memory_space<vmem>>, vector<1x4xf32>,
      %cst_68 = arith.constant 0.000000e+00 : f32
      %92 = vector.broadcast %cst_68 : f32 to vector<16x32xf32>
      %c0_69 = arith.constant 0 : index
      %c0_70 = arith.constant 0 : index
      %93 = vector.load %arg16[%c0_69, %c0_70] : memref<16x32xf32, #tpu.memory_space<vmem>>, vector<16x32xf32>
      tpu.vector_store %arg16[%c0_69, %c0_70], %92 {strides = array<i32>} : memref<16x32xf32, #tpu.memory_space<vmem>>, vector<16x32xf32>,
    } else {
    }
    %c0 = arith.constant 0 : index
    %c0_1 = arith.constant 0 : index
    %3 = vector.load %arg7[%c0, %c0_1] : memref<16x1xi32, #tpu.memory_space<vmem>>, vector<16x1xi32>
    %c0_2 = arith.constant 0 : index
    %c0_3 = arith.constant 0 : index
    %4 = vector.load %arg8[%c0_2, %c0_3] : memref<16x1xi32, #tpu.memory_space<vmem>>, vector<16x1xi32>
    %c0_4 = arith.constant 0 : index
    %c0_5 = arith.constant 0 : index
    %c0_6 = arith.constant 0 : index
    %5 = vector.load %arg9[%c0_4, %c0_5, %c0_6] : memref<1x1x16xi32, #tpu.memory_space<vmem>>, vector<1x1x16xi32>
    %6 = vector.shape_cast %5 : vector<1x1x16xi32> to vector<1x16xi32>
    %7 = tpu.iota {dimensions = array<i32: 1>} : vector<16x16xi32>
    %8 = vector.broadcast %3 : vector<16x1xi32> to vector<16x16xi32>
    %9 = arith.cmpi eq, %7, %8 : vector<16x16xi32>
    %cst = arith.constant 1.000000e+00 : f32
    %cst_7 = arith.constant 0.000000e+00 : f32
    %10 = vector.broadcast %cst : f32 to vector<16x16xf32>
    %11 = vector.broadcast %cst_7 : f32 to vector<16x16xf32>
    %12 = arith.select %9, %10, %11 : vector<16x16xi1>, vector<16x16xf32>
    %13 = arith.truncf %12 : vector<16x16xf32> to vector<16x16xbf16>
    %14 = vector.broadcast %4 : vector<16x1xi32> to vector<16x16xi32>
    %15 = arith.cmpi eq, %7, %14 : vector<16x16xi32>
    %cst_8 = arith.constant 1.000000e+00 : f32
    %cst_9 = arith.constant 0.000000e+00 : f32
    %16 = vector.broadcast %cst_8 : f32 to vector<16x16xf32>
    %17 = vector.broadcast %cst_9 : f32 to vector<16x16xf32>
    %18 = arith.select %15, %16, %17 : vector<16x16xi1>, vector<16x16xf32>
    %19 = arith.truncf %18 : vector<16x16xf32> to vector<16x16xbf16>
    %20 = tpu.iota {dimensions = array<i32: 0>} : vector<16x16xi32>
    %21 = vector.broadcast %6 : vector<1x16xi32> to vector<16x16xi32>
    %22 = arith.cmpi eq, %20, %21 : vector<16x16xi32>
    %cst_10 = arith.constant 1.000000e+00 : f32
    %cst_11 = arith.constant 0.000000e+00 : f32
    %23 = vector.broadcast %cst_10 : f32 to vector<16x16xf32>
    %24 = vector.broadcast %cst_11 : f32 to vector<16x16xf32>
    %25 = arith.select %22, %23, %24 : vector<16x16xi1>, vector<16x16xf32>
    %26 = arith.truncf %25 : vector<16x16xf32> to vector<16x16xbf16>
    %c0_12 = arith.constant 0 : index
    %c0_13 = arith.constant 0 : index
    %27 = vector.load %arg11[%c0_12, %c0_13] : memref<16x32xbf16, #tpu.memory_space<vmem>>, vector<16x32xbf16>
    %cst_14 = arith.constant dense<0.000000e+00> : vector<16x32xf32>
    %28 = tpu.matmul %13, %27, %cst_14 {dimension_numbers = #tpu.dot_dimension_numbers<[1], [0], [0], [1], [0, 0, 1, 1], [], []>} : vector<16x16xbf16>, vector<16x32xbf16>, vector<16x32xf32> -> vector<16x32xf32>
    %c0_15 = arith.constant 0 : index
    %c0_16 = arith.constant 0 : index
    %29 = vector.load %arg12[%c0_15, %c0_16] : memref<16x4xbf16, #tpu.memory_space<vmem>>, vector<16x4xbf16>
    %cst_17 = arith.constant dense<0.000000e+00> : vector<16x4xf32>
    %30 = tpu.matmul %13, %29, %cst_17 {dimension_numbers = #tpu.dot_dimension_numbers<[1], [0], [0], [1], [0, 0, 1, 1], [], []>} : vector<16x16xbf16>, vector<16x4xbf16>, vector<16x4xf32> -> vector<16x4xf32>
    %c0_18 = arith.constant 0 : index
    %c0_19 = arith.constant 0 : index
    %31 = vector.load %arg13[%c0_18, %c0_19] : memref<16x4xbf16, #tpu.memory_space<vmem>>, vector<16x4xbf16>
    %cst_20 = arith.constant dense<0.000000e+00> : vector<16x4xf32>
    %32 = tpu.matmul %19, %31, %cst_20 {dimension_numbers = #tpu.dot_dimension_numbers<[1], [0], [0], [1], [0, 0, 1, 1], [], []>} : vector<16x16xbf16>, vector<16x4xbf16>, vector<16x4xf32> -> vector<16x4xf32>
    %c16_i32 = arith.constant 16 : i32
    %33 = vector.broadcast %c16_i32 : i32 to vector<16x1xi32>
    %34 = arith.cmpi slt, %3, %33 : vector<16x1xi32>
    %35 = arith.addf %30, %32 : vector<16x4xf32>
    %cst_21 = arith.constant -1.000000e+30 : f32
    %36 = vector.shape_cast %34 : vector<16x1xi1> to vector<16x1xi1>
    %37 = vector.broadcast %36 : vector<16x1xi1> to vector<16x4xi1>
    %38 = vector.broadcast %cst_21 : f32 to vector<16x4xf32>
    %39 = arith.select %37, %35, %38 : vector<16x4xi1>, vector<16x4xf32>
    %c0_22 = arith.constant 0 : index
    %c0_23 = arith.constant 0 : index
    %40 = vector.load %arg14[%c0_22, %c0_23] : memref<1x4xf32, #tpu.memory_space<vmem>>, vector<1x4xf32>
    %cst_24 = arith.constant dense<0xFF800000> : vector<4xf32>
    %41 = vector.multi_reduction <maximumf>, %39, %cst_24 [0] : vector<16x4xf32> to vector<4xf32>
    %42 = vector.shape_cast %41 : vector<4xf32> to vector<1x4xf32>
    %43 = arith.maximumf %40, %42 : vector<1x4xf32>
    %44 = arith.subf %40, %43 : vector<1x4xf32>
    %45 = math.exp %44 : vector<1x4xf32>
    %46 = vector.broadcast %43 : vector<1x4xf32> to vector<16x4xf32>
    %47 = arith.subf %39, %46 : vector<16x4xf32>
    %48 = math.exp %47 : vector<16x4xf32>
    %c0_25 = arith.constant 0 : index
    %c0_26 = arith.constant 0 : index
    %49 = vector.load %arg15[%c0_25, %c0_26] : memref<1x4xf32, #tpu.memory_space<vmem>>, vector<1x4xf32>
    %50 = arith.mulf %45, %49 : vector<1x4xf32>
    %cst_27 = arith.constant dense<0.000000e+00> : vector<4xf32>
    %51 = vector.multi_reduction <add>, %48, %cst_27 [0] : vector<16x4xf32> to vector<4xf32>
    %52 = vector.shape_cast %51 : vector<4xf32> to vector<1x4xf32>
    %53 = arith.addf %50, %52 : vector<1x4xf32>
    %c0_28 = arith.constant 0 : index
    %c0_29 = arith.constant 0 : index
    %54 = vector.load %arg15[%c0_28, %c0_29] : memref<1x4xf32, #tpu.memory_space<vmem>>, vector<1x4xf32>
    tpu.vector_store %arg15[%c0_28, %c0_29], %53 {strides = array<i32>} : memref<1x4xf32, #tpu.memory_space<vmem>>, vector<1x4xf32>,
    %c0_30 = arith.constant 0 : index
    %c0_31 = arith.constant 0 : index
    %55 = vector.load %arg14[%c0_30, %c0_31] : memref<1x4xf32, #tpu.memory_space<vmem>>, vector<1x4xf32>
    tpu.vector_store %arg14[%c0_30, %c0_31], %43 {strides = array<i32>} : memref<1x4xf32, #tpu.memory_space<vmem>>, vector<1x4xf32>,
    %c0_32 = arith.constant 0 : index
    %c0_33 = arith.constant 0 : index
    %56 = vector.load %arg6[%c0_32, %c0_33] : memref<4x32xf32, #tpu.memory_space<vmem>>, vector<4x32xf32>
    %cst_34 = arith.constant dense<0.000000e+00> : vector<16x32xf32>
    %57 = tpu.matmul %48, %56, %cst_34 {dimension_numbers = #tpu.dot_dimension_numbers<[1], [0], [0], [1], [0, 0, 1, 1], [], []>} : vector<16x4xf32>, vector<4x32xf32>, vector<16x32xf32> -> vector<16x32xf32>
    %cst_35 = arith.constant dense<0.000000e+00> : vector<1x32xf32>
    %58 = tpu.matmul %45, %56, %cst_35 {dimension_numbers = #tpu.dot_dimension_numbers<[1], [0], [0], [1], [0, 0, 1, 1], [], []>} : vector<1x4xf32>, vector<4x32xf32>, vector<1x32xf32> -> vector<1x32xf32>
    %59 = arith.mulf %28, %57 : vector<16x32xf32>
    %60 = arith.truncf %59 : vector<16x32xf32> to vector<16x32xbf16>
    %c0_36 = arith.constant 0 : index
    %c0_37 = arith.constant 0 : index
    %61 = vector.load %arg16[%c0_36, %c0_37] : memref<16x32xf32, #tpu.memory_space<vmem>>, vector<16x32xf32>
    %62 = vector.broadcast %58 : vector<1x32xf32> to vector<16x32xf32>
    %63 = arith.mulf %61, %62 : vector<16x32xf32>
    %cst_38 = arith.constant dense<0.000000e+00> : vector<16x32xf32>
    %64 = tpu.matmul %26, %60, %cst_38 {dimension_numbers = #tpu.dot_dimension_numbers<[1], [0], [0], [1], [0, 0, 1, 1], [], []>} : vector<16x16xbf16>, vector<16x32xbf16>, vector<16x32xf32> -> vector<16x32xf32>
    %65 = arith.addf %63, %64 : vector<16x32xf32>
    %c0_39 = arith.constant 0 : index
    %c0_40 = arith.constant 0 : index
    %66 = vector.load %arg16[%c0_39, %c0_40] : memref<16x32xf32, #tpu.memory_space<vmem>>, vector<16x32xf32>
    tpu.vector_store %arg16[%c0_39, %c0_40], %65 {strides = array<i32>} : memref<16x32xf32, #tpu.memory_space<vmem>>, vector<16x32xf32>,
    %c2_i32 = arith.constant 2 : i32
    %67 = arith.cmpi eq, %arg0, %c2_i32 : i32
    %68 = arith.extui %67 : i1 to i32
    %c0_i32_41 = arith.constant 0 : i32
    %69 = arith.cmpi ne, %68, %c0_i32_41 : i32
    scf.if %69 {
      %c0_42 = arith.constant 0 : index
      %c0_43 = arith.constant 0 : index
      %70 = vector.load %arg15[%c0_42, %c0_43] : memref<1x4xf32, #tpu.memory_space<vmem>>, vector<1x4xf32>
      %71 = tpu.reciprocal %70 {approx = true} : vector<1x4xf32> -> vector<1x4xf32>
      %cst_44 = arith.constant dense<0.000000e+00> : vector<1x32xf32>
      %72 = tpu.matmul %71, %56, %cst_44 {dimension_numbers = #tpu.dot_dimension_numbers<[1], [0], [0], [1], [0, 0, 1, 1], [], []>} : vector<1x4xf32>, vector<4x32xf32>, vector<1x32xf32> -> vector<1x32xf32>
      %c0_45 = arith.constant 0 : index
      %c0_46 = arith.constant 0 : index
      %73 = vector.load %arg16[%c0_45, %c0_46] : memref<16x32xf32, #tpu.memory_space<vmem>>, vector<16x32xf32>
      %74 = vector.broadcast %72 : vector<1x32xf32> to vector<16x32xf32>
      %75 = arith.mulf %73, %74 : vector<16x32xf32>
      %c0_47 = arith.constant 0 : index
      %c0_48 = arith.constant 0 : index
      %76 = vector.load %arg10[%c0_47, %c0_48] : memref<16x32xf32, #tpu.memory_space<vmem>>, vector<16x32xf32>
      tpu.vector_store %arg10[%c0_47, %c0_48], %75 {strides = array<i32>} : memref<16x32xf32, #tpu.memory_space<vmem>>, vector<16x32xf32>,
    } else {
    }
    return
  }
  func.func @transform_0(%arg0: i32) -> (i32, i32) {
    %c0_i32 = arith.constant 0 : i32
    %c0_i32_0 = arith.constant 0 : i32
    %c0_i32_1 = arith.constant 0 : i32
    return %c0_i32, %c0_i32_0 : i32, i32
  }
  func.func @transform_1(%arg0: i32) -> (i32, i32) {
    %c0_i32 = arith.constant 0 : i32
    %c0_i32_0 = arith.constant 0 : i32
    %c0_i32_1 = arith.constant 0 : i32
    return %c0_i32, %c0_i32_0 : i32, i32
  }
  func.func @transform_2(%arg0: i32) -> (i32, i32) {
    %c0_i32 = arith.constant 0 : i32
    %c0_i32_0 = arith.constant 0 : i32
    %c0_i32_1 = arith.constant 0 : i32
    return %c0_i32, %c0_i32_0 : i32, i32
  }
  func.func @transform_3(%arg0: i32) -> (i32, i32) {
    %c0_i32 = arith.constant 0 : i32
    %c0_i32_0 = arith.constant 0 : i32
    %c0_i32_1 = arith.constant 0 : i32
    return %c0_i32, %c0_i32_0 : i32, i32
  }
  func.func @transform_4(%arg0: i32) -> (i32, i32) {
    %c0_i32 = arith.constant 0 : i32
    %c0_i32_0 = arith.constant 0 : i32
    %c0_i32_1 = arith.constant 0 : i32
    return %c0_i32, %c0_i32_0 : i32, i32
  }
  func.func @transform_5(%arg0: i32) -> (i32, i32) {
    %c0_i32 = arith.constant 0 : i32
    %c0_i32_0 = arith.constant 0 : i32
    %c0_i32_1 = arith.constant 0 : i32
    return %c0_i32, %c0_i32_0 : i32, i32
  }
  func.func @transform_6(%arg0: i32) -> (i32, i32) {
    %c0_i32 = arith.constant 0 : i32
    %c0_i32_0 = arith.constant 0 : i32
    return %arg0, %c0_i32 : i32, i32
  }
  func.func @transform_7(%arg0: i32) -> (i32, i32) {
    %c0_i32 = arith.constant 0 : i32
    %c0_i32_0 = arith.constant 0 : i32
    return %arg0, %c0_i32 : i32, i32
  }
  func.func @transform_8(%arg0: i32) -> (i32, i32, i32) {
    %c0_i32 = arith.constant 0 : i32
    %c0_i32_0 = arith.constant 0 : i32
    %c0_i32_1 = arith.constant 0 : i32
    return %arg0, %c0_i32, %c0_i32_0 : i32, i32, i32
  }
  func.func @transform_9(%arg0: i32) -> (i32, i32) {
    %c0_i32 = arith.constant 0 : i32
    %c0_i32_0 = arith.constant 0 : i32
    %c0_i32_1 = arith.constant 0 : i32
    return %c0_i32, %c0_i32_0 : i32, i32
  }
}

</mosaic_0001>

<bundles_post_ra>
// kernel: tpu_custom_call.1
= control target key start
LH: loop header
LB: loop body
LE: loop exit
PB: predicated region body
PF: predicated region fallthrough
CT: control target
= control target key end

     0   :  { %14 = vsyncpa [#allocation9], 0  ;;  %s1584_s30 = smov 0   ;;  %s1746_s0 = inlined_call_operand.vmem [shape: f32[16,8], index: 0, kind: input, shape index: {}]   ;;  %s1747_s1 = inlined_call_operand.vmem [shape: f32[8,32], index: 1, kind: input, shape index: {}]   ;;  %s1748_s2 = inlined_call_operand.vmem [shape: f32[8,32], index: 2, kind: input, shape index: {}]   ;;  %s1749_s3 = inlined_call_operand.vmem [shape: f32[32,4], index: 3, kind: input, shape index: {}]   ;;  %s1750_s4 = inlined_call_operand.vmem [shape: f32[32,4], index: 4, kind: input, shape index: {}]   ;;  %s1751_s5 = inlined_call_operand.vmem [shape: f32[4,32], index: 5, kind: input, shape index: {}]   ;;  %s1752_s6 = inlined_call_operand.vmem [shape: s32[48,1], index: 6, kind: input, shape index: {}]   ;;  %s1753_s7 = inlined_call_operand.vmem [shape: s32[48,1], index: 7, kind: input, shape index: {}]   ;;  %s1754_s8 = inlined_call_operand.vmem [shape: s32[3,1,16], index: 8, kind: input, shape index: {}]   ;;  %s1755_s9 = inlined_call_operand.hbm [shape: f32[16,32], index: 9, kind: output, shape index: {}]  }
   0x1 LB: > { %s1590_s10 = sadd.s32 4294967295, %s1521_s30   ;;  %p1301_p0 = scmp.ge.s32.totalorder %s1521_s30, 1  ;;  %s1521_s30 = sphi %s1584_s30, %s20_s30  }
   0x2   : > { %p303_p1 = scmp.lt.s32.totalorder %s1521_s30, 4 }
   0x4   : > { %p304_p2 = pnand %p1301_p0, %p303_p1 }
   0x5   : > { %s1302_s11 = sshll.u32 (!%p304_p2), %s1590_s10, 1  ;;  %p354_p3 = scmp.lt.s32.totalorder (!%p304_p2), %s1590_s10, 2 }
   0x6   : > { %307 = sbr.rel (%p304_p2) target bundleno = 1431 (0x597), region = 56  ;;  %p343_p4 = scmp.lt.s32.totalorder (!%p304_p2), %s1302_s11, 5 }
   0x7   : > { %p1306_p5 = scmp.ne.s32.totalorder (!%p304_p2), %s1590_s10, 0 }
   0xb   : > { %s1597_s12 = scalar_select %p354_p3, %s1590_s10, 2 }
   0xc   : > { %s1757_s11 = smov (!%p343_p4, %s1302_s11), 5  ;;  %361 = sbr.rel (%p1306_p5) target bundleno = 420 (0x1a4), region = 60 }
   0xd   : > { %s356_s15 = scalar_lea.vmem %s1754_s8, %s1597_s12  ;;  %s1303_s16 = sshll.u32 %s1757_s11, 3 }
   0xe   : > { %s1606_s19 = scalar_lea.vmem %s1752_s6, %s1303_s16  ;;  %s1611_s22 = scalar_lea.vmem %s1753_s7, %s1303_s16 }
  0x11   : > { %vm665_vm0 = vcmask 24576   ;;  %v365_v0 = vld [vmem:[%s1747_s1] sm:$0xff]  ;;  %vm371_vm1 = vcmask 1043456   ;;  %v1523_v1 = vmov 0.0   ;;  %v1524_v2 = vmov -1e+30  }
  0x12   : > { %1376 = vmatprep.subr.bf16.mxu0 %v1523_v1  ;;  %666 = vst.msk [vmem:[#allocation5] sm:$0x1] %vm665_vm0, %v1524_v2  ;;  %667 = vst.msk [vmem:[#allocation6] sm:$0x1] %vm665_vm0, %v1523_v1  ;;  %1382 = vmatprep.subr.bf16.mxu1 %v1523_v1  ;;  %v366_v3 = vpack.c.bf16 %v365_v0, %v365_v0  ;;  %v416_v4 = vld [vmem:[%s1748_s2] sm:$0xff]  ;;  %v363_v6 = vld [vmem:[%s1746_s0 + $0x8] sm:$0xff] }
  0x13   : > { %v362_v5 = vld [vmem:[%s1746_s0] sm:$0xff]  ;;  %v417_v7 = vpack.c.bf16 %v416_v4, %v416_v4  ;;  %vm1525_vm2 = vmmov 0   ;;  %v465_v8 = vld [vmem:[%s1749_s3 + $0x18] sm:$0xff]  ;;  %vm367_vm3 = vcmask 64512   ;;  %v464_v13 = vld [vmem:[%s1749_s3 + $0x10] sm:$0xff]  ;;  %vm466_vm4 = vcmask 261120  }
  0x14   : > { %1378 = vmatprep.mubr.msk.bf16.mxu0 %vm1525_vm2, %v1523_v1  ;;  %1384 = vmatprep.mubr.msk.bf16.mxu1 %vm1525_vm2, %v1523_v1  ;;  %v373_v9 = vsel %vm371_vm1, %v366_v3, 0  ;;  %v364_v10 = vpack.c.bf16 %v363_v6, %v362_v5  ;;  %v551_v11 = vld [vmem:[%s1750_s4 + $0x18] sm:$0xff]  ;;  %v550_v14 = vld [vmem:[%s1750_s4 + $0x10] sm:$0xff]  ;;  %v463_v15 = vld [vmem:[%s1749_s3 + $0x8] sm:$0xff]  ;;  %668 = vst.msk [vmem:[#allocation7] sm:$0xff] %vm466_vm4, %v1523_v1  ;;  %vm641_vm5 = vcmask 257024  }
  0x15   : > { %1377 = vmatpush3.bf16.msra.mxu0 %v373_v9  ;;  %v419_v12 = vsel %vm371_vm1, %v417_v7, 0  ;;  %v549_v16 = vld [vmem:[%s1750_s4 + $0x8] sm:$0xff]  ;;  %669 = vst.msk [vmem:[#allocation7 + $0x8] sm:$0xff] %vm466_vm4, %v1523_v1  ;;  %v462_v17 = vld [vmem:[%s1749_s3] sm:$0xff]  ;;  %vm652_vm6 = vcmask 27648  }
  0x16   : > { %1383 = vmatpush3.bf16.msra.mxu1 %v419_v12  ;;  %1388 = vmatprep.subr.mxu0 %v465_v8  ;;  %v548_v18 = vld [vmem:[%s1750_s4] sm:$0xff] }
  0x17   : > { %1399 = vmatprep.subr.mxu1 %v551_v11 }
  0x18   : > { %1379 = vmatmul.mubr.msk.bf16.vlgmr.msra.gmra.mxu0 %vm367_vm3, %v364_v10 }
  0x19   : > { %1385 = vmatmul.mubr.msk.bf16.vlgmr.msra.gmra.mxu1 %vm367_vm3, %v364_v10  ;;  %1389 = vmatpush3.msra.mxu0 %v465_v8 }
  0x1a   : > { %1400 = vmatpush3.msra.mxu1 %v551_v11  ;;  %1390 = vmatprep.subr.mxu0 %v464_v13 }
  0x1b   : > { %1401 = vmatprep.subr.mxu1 %v550_v14  ;;  %1391 = vmatpush3.msra.mxu0 %v464_v13 }
  0x1c   : > { %1402 = vmatpush3.msra.mxu1 %v550_v14  ;;  %1392 = vmatprep.subr.mxu0 %v463_v15 }
  0x1d   : > { %1403 = vmatprep.subr.mxu1 %v549_v16  ;;  %1393 = vmatpush3.msra.mxu0 %v463_v15 }
  0x1e   : > { %1404 = vmatpush3.msra.mxu1 %v549_v16  ;;  %1394 = vmatprep.subr.mxu0 %v462_v17 }
  0x1f   : > { %1405 = vmatprep.subr.mxu1 %v548_v18  ;;  %1395 = vmatpush3.msra.mxu0 %v462_v17 }
  0x20   : > { %1406 = vmatpush3.msra.mxu1 %v548_v18 }
  0xd8   : > { %v409_v19 = vpop.f32.mrf.mxu0 }
  0xd9   : > { %v1339_v20 = vpack.c.bf16 %v409_v19, %v409_v19  ;;  %v455_v21 = vpop.f32.mrf.mxu1  ;;  %1396 = vmatprep.mubr.msk.f32.mxu0 %vm466_vm4, %v409_v19 }
  0xda   : > { %1407 = vmatprep.mubr.msk.f32.mxu1 %vm466_vm4, %v455_v21  ;;  %v1380_v22 = vpop.f32.mrf.mxu0 }
  0xdb   : > { %642 = vst.msk [vmem:[#allocation2] sm:$0xf] %vm641_vm5, %v1339_v20  ;;  %v1386_v23 = vpop.f32.mrf.mxu1 }
  0xdc   : > { %v412_v24 = vpop.f32.mrf.mxu0 }
  0xdd   : > { %v1340_v25 = vpack.c.bf16 %v412_v24, %v412_v24  ;;  %v458_v26 = vpop.f32.mrf.mxu1  ;;  %1397 = vmatmul.mubr.msk.f32.vlgmr.msra.gmra.mxu0 %vm466_vm4, %v412_v24 }
  0xde   : > { %1408 = vmatmul.mubr.msk.f32.vlgmr.msra.gmra.mxu1 %vm466_vm4, %v458_v26  ;;  %v1381_v27 = vpop.f32.mrf.mxu0 }
  0xdf   : > { %643 = vst.msk [vmem:[#allocation2 + $0x4] sm:$0xf] %vm641_vm5, %v1340_v25  ;;  %v1387_v28 = vpop.f32.mrf.mxu1 }
 0x19d   : > { %v1398_v29 = vpop.f32.mrf.mxu0 }
 0x19e   : > { %v1342_v30 = vpack.c.bf16 %v1398_v29, %v1398_v29  ;;  %v1409_v31 = vpop.f32.mrf.mxu1 }
 0x19f   : > { %v1344_v32 = vpack.c.bf16 %v1409_v31, %v1409_v31  ;;  %v539_v33 = vpop.f32.mrf.mxu0 }
 0x1a0   : > { %654 = vst.msk [vmem:[#allocation3 + $0x4] sm:$0xf] %vm652_vm6, %v1342_v30  ;;  %v1341_v34 = vpack.c.bf16 %v539_v33, %v539_v33  ;;  %v624_v35 = vpop.f32.mrf.mxu1 }
 0x1a1   : > { %664 = vst.msk [vmem:[#allocation4 + $0x4] sm:$0xf] %vm652_vm6, %v1344_v32  ;;  %v1343_v36 = vpack.c.bf16 %v624_v35, %v624_v35 }
 0x1a2   : > { %653 = vst.msk [vmem:[#allocation3] sm:$0xf] %vm652_vm6, %v1341_v34 }
 0x1a3   : > { %663 = vst.msk [vmem:[#allocation4] sm:$0xf] %vm652_vm6, %v1343_v36 }
 0x1a4 PF: > { %v672_v37 = vld [vmem:[%s1611_s22] sm:$0xff]  ;;  %v1526_v39 = vmov 0   ;;  %v673_v40 = vld [vmem:[%s1611_s22 + $0x8] sm:$0xff]  ;;  %v1527_v43 = vmov 0.0   ;;  %vm1528_vm9 = vmmov 0   ;;  %v675_v47 = vlaneseq  ;;  %p1332_p6 = scmp.ne.s32.totalorder %s1590_s10, 2 }
 0x1a5   : > { %v670_v38 = vld [vmem:[%s1606_s19] sm:$0xff]  ;;  %1475 = vset.pattern.permute.xlu1 %v1526_v39  ;;  %1474 = vset.pattern.permute.xlu0 %v1526_v39  ;;  %v671_v41 = vld [vmem:[%s1606_s19 + $0x8] sm:$0xff]  ;;  %vm719_vm14 = vcmask 130048   ;;  %vm928_vm15 = vcmask 1043456   ;;  %vm880_vm1 = vcmask 31744   ;;  %vm918_vm3 = vcmask 24576  }
 0x1a6   : > { %689 = vperm.xlu1 %1475, %v672_v37   ;;  %678 = vperm.xlu0 %1474, %v670_v38   ;;  %v1476_v42 = vld [vmem:[#allocation2] sm:$0xff]   ;;  %vm818_vm7 = vcmp.lt.s32.totalorder %v670_v38, 16  ;;  %vm819_vm8 = vcmp.lt.s32.totalorder %v671_v41, 16  ;;  %v676_v48 = vand.u32 127, %v675_v47  ;;  %v700_v21 = vshrl.u32 %v675_v47, 7 }
 0x1a7   : > { %1410 = vmatprep.subr.bf16.mxu0 %v1527_v43  ;;  %1416 = vmatprep.subr.bf16.mxu1 %v1527_v43  ;;  %v868_v45 = vsel %vm819_vm8, 1, %v1526_v39  ;;  %v867_v46 = vsel %vm818_vm7, 1, %v1526_v39  ;;  %v1684_v60 = vld [vmem:[%s1751_s5] sm:$0xf]  ;;  %v879_v24 = vld [vmem:[#allocation5] sm:$0x1] }
 0x1a8   : > { %1411 = vmatpush3.bf16.msra.mxu0 %v1476_v42  ;;  %1412 = vmatprep.mubr.msk.bf16.mxu0 %vm1528_vm9, %v1527_v43  ;;  %v1697_v26 = vsub.s32 0, %v700_v21  ;;  %vm1137_vm6 = vcmask 261120  }
 0x1a9   : > { %1418 = vmatprep.mubr.msk.bf16.mxu1 %vm1528_vm9, %v1527_v43  ;;  %1422 = vmatprep.subr.bf16.mxu0 %v1527_v43  ;;  %v1478_v57 = vld [vmem:[#allocation3] sm:$0xff]  }
 0x1aa   : > { %v1477_v44 = vld [vmem:[#allocation4] sm:$0xff]   ;;  %692 = vperm.xlu1 %1475, %v673_v40   ;;  %681 = vperm.xlu0 %1474, %v671_v41  }
 0x1ab   : > { %1417 = vmatpush3.bf16.msra.mxu1 %v1477_v44 }
 0x1ac   : > { %1428 = vmatprep.subr.msk.mxu1 %vm928_vm15, %v1684_v60 }
 0x1ae   : > { %873 = vperm.xlu1 %1475, %v868_v45   ;;  %870 = vperm.xlu0 %1474, %v867_v46   ;;  %v906_v46 = vld [vmem:[#allocation6] sm:$0x1] }
 0x221   : > { %v690_v49 = vpop.permute.xlu1 %689  ;;  %v679_v50 = vpop.permute.xlu0 %678 }
 0x222   : > { %vm694_vm10 = vcmp.eq.s32.totalorder %v676_v48, %v690_v49  ;;  %vm683_vm11 = vcmp.eq.s32.totalorder %v676_v48, %v679_v50 }
 0x223   : > { %v696_v51 = vsel %vm694_vm10, 1.0, %v1527_v43  ;;  %v685_v54 = vsel %vm683_vm11, 1.0, %v1527_v43 }
 0x225   : > { %v693_v52 = vpop.permute.xlu1 %692  ;;  %v682_v53 = vpop.permute.xlu0 %681 }
 0x226   : > { %vm695_vm12 = vcmp.eq.s32.totalorder %v676_v48, %v693_v52  ;;  %vm684_vm13 = vcmp.eq.s32.totalorder %v676_v48, %v682_v53  ;;  %v1319_v52 = vld [vmem:[%s356_s15] ss:$0 sm:$0xff] }
 0x227   : > { %v697_v55 = vsel %vm695_vm12, 1.0, %v1527_v43  ;;  %v686_v56 = vsel %vm684_vm13, 1.0, %v1527_v43  ;;  %vm706_vm4 = vcmp.eq.s32.totalorder %v700_v21, %v1319_v52 }
 0x228   : > { %v698_v58 = vpack.c.bf16 %v697_v55, %v696_v51  ;;  %v687_v59 = vpack.c.bf16 %v686_v56, %v685_v54  ;;  %v701_v51 = vadd.s32 8, %v700_v21 }
 0x229   : > { %v871_v6 = vpop.permute.xlu0 %870  ;;  %v874_v9 = vpop.permute.xlu1 %873 }
 0x22a   : > { %1413 = vmatmul.mubr.msk.bf16.vlgmr.msra.gmra.mxu0 %vm719_vm14, %v687_v59  ;;  %1419 = vmatmul.mubr.msk.bf16.vlgmr.msra.gmra.mxu1 %vm719_vm14, %v698_v58  ;;  %vm875_vm0 = vcmp.eq.s32.totalorder %v871_v6, 1  ;;  %vm876_vm2 = vcmp.eq.s32.totalorder %v874_v9, 1  ;;  %vm707_vm5 = vcmp.eq.s32.totalorder %v701_v51, %v1319_v52 }
 0x22b   : > { %1423 = vmatpush3.bf16.msra.mxu0 %v1478_v57  ;;  %1424 = vmatprep.mubr.msk.bf16.mxu0 %vm1528_vm9, %v1527_v43  ;;  %v708_v57 = vsel %vm706_vm4, 1.0, %v1527_v43  ;;  %v709_v58 = vsel %vm707_vm5, 1.0, %v1527_v43 }
 0x22c   : > { %1438 = vmatprep.subr.bf16.mxu0 %v1527_v43  ;;  %1429 = vmatpush3.msk.msra.mxu1 %vm928_vm15, %v1684_v60 }
 0x22d   : > { %1433 = vmatprep.subr.mxu1 %v1527_v43 }
 0x232   : > { %1425 = vmatmul.mubr.msk.bf16.vlgmr.msra.gmra.mxu0 %vm719_vm14, %v687_v59 }
 0x233   : > { %1440 = vmatprep.mubr.msk.bf16.mxu0 %vm1528_vm9, %v1527_v43 }
 0x2ea   : > { %v1691_v61 = vpop.f32.mrf.mxu0  ;;  %v811_v62 = vpop.f32.mrf.mxu1 }
 0x2ec   : > { %v1414_v63 = vpop.f32.mrf.mxu0  ;;  %v1420_v0 = vpop.f32.mrf.mxu1 }
 0x2ed   : > { %v710_v0 = vpack.c.bf16 %v709_v58, %v708_v57 }
 0x2ee   : > { %v1693_v1 = vpop.f32.mrf.mxu0  ;;  %v814_v2 = vpop.f32.mrf.mxu1 }
 0x2f0   : > { %v1415_v3 = vpop.f32.mrf.mxu0  ;;  %v1421_v4 = vpop.f32.mrf.mxu1 }
 0x2f1   : > { %v1083_v3 = vld [vmem:[#allocation7] sm:$0xff] }
 0x2f2   : > { %v860_v5 = vpop.f32.mrf.mxu0 }
 0x2f3   : > { %v861_v7 = vadd.f32 %v860_v5, %v811_v62 }
 0x2f4   : > { %v1426_v8 = vpop.f32.mrf.mxu0 }
 0x2f5   : > { %v877_v11 = vsel %vm875_vm0, %v861_v7, -1e+30 }
 0x2f6   : > { %v863_v10 = vpop.f32.mrf.mxu0  ;;  %v881_v15 = vsel %vm880_vm1, %v877_v11, -inf }
 0x2f7   : > { %v864_v12 = vadd.f32 %v863_v10, %v814_v2 }
 0x2f8   : > { %v1427_v13 = vpop.f32.mrf.mxu0 }
 0x2f9   : > { %v878_v14 = vsel %vm876_vm2, %v864_v12, -1e+30 }
 0x2fa   : > { %v882_v16 = vsel %vm880_vm1, %v878_v14, -inf }
 0x2fb   : > { %v883_v17 = vmax.f32 %v881_v15, %v882_v16 }
 0x2fd   : > { %v884_v18 = vrot.slane %v883_v17, 4 }
 0x2ff   : > { %v885_v19 = vmax.f32 %v883_v17, %v884_v18 }
 0x301   : > { %v886_v20 = vrot.slane %v885_v19, 2 }
 0x303   : > { %v887_v22 = vmax.f32 %v885_v19, %v886_v20 }
 0x305   : > { %v888_v23 = vrot.slane %v887_v22, 1 }
 0x307   : > { %v889_v25 = vmax.f32 %v887_v22, %v888_v23 }
 0x309   : > { %v890_v27 = vmax.f32 %v879_v24, %v889_v25 }
 0x30b   : > { %v898_v28 = vrot.slane %v890_v27, %v1697_v26  ;;  %920 = vst.msk [vmem:[#allocation5] sm:$0x1] %vm918_vm3, %v890_v27  ;;  %v891_v31 = vsub.f32 %v879_v24, %v890_v27 }
 0x30d   : > { %v900_v29 = vsub.f32 %v877_v11, %v898_v28  ;;  %v901_v30 = vsub.f32 %v878_v14, %v898_v28  ;;  %v892_v34 = vmul.f32 1.442695, %v891_v31 }
 0x30f   : > { %v902_v32 = vmul.f32 1.442695, %v900_v29  ;;  %v904_v33 = vmul.f32 1.442695, %v901_v30 }
 0x311   : > { %1479 = vpow2.f32 %v902_v32 }
 0x312   : > { %1481 = vpow2.f32 %v904_v33 }
 0x313   : > { %1483 = vpow2.f32 %v892_v34 }
 0x31e   : > { %v1480_v35 = vpop.eup %1479 }
 0x31f   : > { %v1482_v36 = vpop.eup %1481  ;;  %v908_v37 = vsel %vm880_vm1, %v1480_v35, 0.0  ;;  %1430 = vmatprep.mubr.msk.f32.mxu1 %vm880_vm1, %v1480_v35 }
 0x320   : > { %v909_v38 = vsel %vm880_vm1, %v1482_v36, 0.0  ;;  %1431 = vmatmul.mubr.msk.f32.vlgmr.msra.gmra.mxu1 %vm880_vm1, %v1482_v36  ;;  %v1484_v40 = vpop.eup %1483 }
 0x321   : > { %v910_v39 = vadd.f32 %v909_v38, %v908_v37  ;;  %1434 = vmatpush3.msk.msra.mxu1 %vm928_vm15, %v1684_v60  ;;  %1435 = vmatprep.mubr.msk.f32.mxu1 %vm1528_vm9, %v1527_v43  ;;  %v907_v48 = vmul.f32 %v1484_v40, %v906_v46 }
 0x323   : > { %v911_v41 = vrot.slane %v910_v39, 4 }
 0x324   : > { %1436 = vmatmul.mubr.msk.f32.vlgmr.msra.gmra.mxu1 %vm880_vm1, %v1484_v40 }
 0x325   : > { %v912_v42 = vadd.f32 %v911_v41, %v910_v39 }
 0x327   : > { %v913_v44 = vrot.slane %v912_v42, 2 }
 0x329   : > { %v914_v45 = vadd.f32 %v913_v44, %v912_v42 }
 0x32b   : > { %v915_v47 = vrot.slane %v914_v45, 1 }
 0x32d   : > { %v916_v49 = vadd.f32 %v915_v47, %v914_v45 }
 0x32f   : > { %v917_v50 = vadd.f32 %v916_v49, %v907_v48 }
 0x331   : > { %919 = vst.msk [vmem:[#allocation6] sm:$0x1] %vm918_vm3, %v917_v50 }
 0x3e0   : > { %v1432_v53 = vpop.f32.mrf.mxu1 }
 0x3e1   : > { %v1081_v55 = vmul.f32 %v1432_v53, %v1693_v1  ;;  %v1084_v1 = vld [vmem:[#allocation7 + $0x8] sm:$0xff] }
 0x3e2   : > { %v998_v54 = vpop.f32.mrf.mxu1 }
 0x3e3   : > { %v1080_v56 = vmul.f32 %v998_v54, %v1691_v61 }
 0x3e4   : > { %v1076_v59 = vpop.f32.mrf.mxu1 }
 0x3e5   : > { %v1082_v62 = vpack.c.bf16 %v1081_v55, %v1080_v56  ;;  %v1088_v2 = vrot.slane %v1076_v59, %v1697_v26 }
 0x3e6   : > { %v1437_v63 = vpop.f32.mrf.mxu1 }
 0x3e7   : > { %1439 = vmatpush3.bf16.msra.mxu0 %v1082_v62  ;;  %v1089_v4 = vmul.f32 %v1088_v2, %v1083_v3  ;;  %v1090_v7 = vmul.f32 %v1088_v2, %v1084_v1 }
 0x3ea   : > { %1441 = vmatmul.mubr.msk.bf16.vlgmr.msra.gmra.mxu0 %vm719_vm14, %v710_v0 }
 0x4aa   : > { %v1128_v5 = vpop.f32.mrf.mxu0 }
 0x4ab   : > { %v1135_v6 = vadd.f32 %v1128_v5, %v1089_v4 }
 0x4ac   : > { %v1442_v61 = vpop.f32.mrf.mxu0 }
 0x4ad   : > { %1138 = vst.msk [vmem:[#allocation7] sm:$0xff] %vm1137_vm6, %v1135_v6  ;;  %1143 = sbr.rel (%p1332_p6) target bundleno = 1415 (0x587), region = 64 }
 0x4ae   : > { %v1131_v43 = vpop.f32.mrf.mxu0 }
 0x4af   : > { %v1136_v8 = vadd.f32 %v1131_v43, %v1090_v7 }
 0x4b0   : > { %v1443_v9 = vpop.f32.mrf.mxu0 }
 0x4b1   : > { %1139 = vst.msk [vmem:[#allocation7 + $0x8] sm:$0xff] %vm1137_vm6, %v1136_v8 }
 0x4b2   : > { %v1144_v10 = vld [vmem:[#allocation6] sm:$0x1]  ;;  %v1529_v11 = vmov 0.0   ;;  %vm1530_vm7 = vmmov 0  }
 0x4b3   : > { %1444 = vmatprep.subr.mxu0 %v1529_v11  ;;  %1446 = vmatprep.mubr.msk.f32.mxu0 %vm1530_vm7, %v1529_v11  ;;  %1485 = vrcp.f32 %v1144_v10 }
 0x4b4   : > { %1445 = vmatpush3.msk.msra.mxu0 %vm928_vm15, %v1684_v60  ;;  %v1219_v14 = vld [vmem:[#allocation7] sm:$0xff] }
 0x4b8   : > { %v1220_v15 = vld [vmem:[#allocation7 + $0x8] sm:$0xff] }
 0x4c0   : > { %v1486_v12 = vpop.eup %1485 }
 0x4c1   : > { %1447 = vmatmul.mubr.msk.f32.vlgmr.msra.gmra.mxu0 %vm880_vm1, %v1486_v12 }
 0x581   : > { %v1215_v13 = vpop.f32.mrf.mxu0 }
 0x582   : > { %v1224_v16 = vrot.slane %v1215_v13, %v1697_v26 }
 0x583   : > { %v1448_v17 = vpop.f32.mrf.mxu0 }
 0x584   : > { %v1225_v18 = vmul.f32 %v1224_v16, %v1219_v14  ;;  %v1226_v19 = vmul.f32 %v1224_v16, %v1220_v15 }
 0x586   : > { %1227 = vst.msk [vmem:[#allocation8] sm:$0xff] %vm1137_vm6, %v1225_v18  ;;  %1228 = vst.msk [vmem:[#allocation8 + $0x8] sm:$0xff] %vm1137_vm6, %v1226_v19 }
 0x587 PF: > { %p1453_p7 = scmp.eq.s32.totalorder %s1590_s10, 2  ;;  %s1531_s12 = smov [#allocation8]  }
 0x588   : > { %s1235_s15 = sshll.u32 %s1531_s12, 4  ;;  %s1236_s15 = int_to_ptr.vmem [resolvable:$true] %s1235_s15 }
 0x589   : > { %s1487_s17 = scalar_lea.vmem %s1236_s15, 256  ;;  %p1494_p11 = scmp.lt.s32.totalorder %s1236_s15, %s1236_s15 }
 0x58a   : > { %p1488_p8 = scmp.ne.s32.totalorder %s1236_s15, %s1487_s17  ;;  %p1495_p12 = scmp.lt.s32.totalorder %s1487_s17, %s1487_s17 }
 0x58c   : > { %p1489_p9 = pnand %p1488_p8, %p1453_p7  ;;  %p1496_p13 = por %p1495_p12, %p1494_p11 }
 0x58e   : > { %p1490_p10 = pneg %p1489_p9 }
 0x590   : > { %p1497_p0 = pnand %p1496_p13, %p1490_p10 }
 0x592   : > { %1500 = shalt.err (!%p1497_p0)
}
 0x593   : > { %s1532_s18 = smov 128   ;;  %s1533_s20 = smov 8  }
 0x594   : > { %1450 = dma.vmem_to_hbm [thread:$0]  (%p1453_p7), %s1236_s15, 256, %s1755_s9, [#allocation9], %s1532_s18, %s1532_s18, %s1533_s20  }
 0x595   : > { %1516 = dma.done.wait (%p1453_p7), [#allocation9], 256  }
 0x596   : > { %1518 = vsyncadd (%p1453_p7), [#allocation9], 4294967040 }
 0x597 PF: > { %s20_s30 = sadd.s32 1, %s1521_s30  }
 0x598   : > { %p17_p1 = scmp.ge.s32.totalorder %s20_s30, 5  }
 0x59a   :  { %19 = sbr.rel (!%p17_p1) target bundleno = 1 (0x1), region = 97 }
 0x59f   :  { %1251 = vsyncpa [#allocation9], 1 }
 0x5a0   :  { %1253 = vsyncpa [#allocation9 + $0x1], 1 }

</bundles_post_ra>
